<compile_context>
chip_gen: v6e
topology: v6e:2x2x1
jax: 0.10.0
libtpu: 0.0.40
codegen_flags: <defaults>
</compile_context>

<pallas_src>
import functools

import numpy as np
import jax
import jax.numpy as jnp
from jax.experimental import pallas as pl
from jax.experimental.pallas import tpu as pltpu


def pam_kernel(q_ref, v_ref, m_ref, wt_ref, b_ref, out_ref, *, head):
    """One program: `bb` batches, all heads.

    Per-program shapes:
      q_ref, v_ref : (H, bb, S, dh)   head-major, pre-split in the wrapper
      m_ref        : (bb, S, S)       float outer product  mask @ mask^T
      wt_ref       : (H, dh, D)       per-head slices of the Linear weight W^T
      b_ref        : (1, D)
      out_ref      : (bb, S, D)
    """
    bb, S, D = out_ref.shape
    dh = q_ref.shape[-1]

    mask2d = m_ref[...] != 0.0                        # (bb, S, S) bool
    inv_scale = jnp.float32(dh ** -0.25)              # multiply, not divide
    neg_big = jnp.float32(-10000000.0)

    acc = jnp.zeros((bb * S, D), jnp.float32)         # projection accumulator

    for h in range(head):                             # static unroll over heads
        qh = q_ref[h].astype(jnp.float32)             # (bb, S, dh)
        vh = v_ref[h].astype(jnp.float32)             # (bb, S, dh)

        # scores[b, i, j] = (q_i . q_j) / dh**0.25   (q == k in PAM)
        s = jnp.einsum('bsd,btd->bst', qh, qh,
                       preferred_element_type=jnp.float32) * inv_scale
        s = jnp.where(mask2d, s, neg_big)

        # Reference: softmax over torch dim=2, then transpose(2, 3).  Because
        # q == k and the mask is an outer product, the masked scores are
        # symmetric, so softmax over the LAST axis (lane-axis reduce) with no
        # transpose is exactly equivalent.  Only valid while q == k!
        s = s - jnp.max(s, axis=-1, keepdims=True)
        e = jnp.exp(s)
        a = e * pl.reciprocal(jnp.sum(e, axis=-1, keepdims=True), approx=True)

        vo = jnp.einsum('bst,btd->bsd', a, vh,
                        preferred_element_type=jnp.float32)        # (bb, S, dh)

        # Per-head slice of the Linear: equivalent to concatenating heads along
        # the embedding axis and doing one (bb*S, D) @ (D, D) matmul, but with
        # no in-kernel lane concatenation.
        acc = acc + jnp.dot(vo.reshape(bb * S, dh), wt_ref[h],
                            preferred_element_type=jnp.float32)

    y = acc + b_ref[...]                              # (bb*S, D) + (1, D)
    out_ref[...] = jnp.maximum(y, 0.0).reshape(bb, S, D).astype(out_ref.dtype)
    # TODO(synk): nn.Dropout is instantiated in __init__ but never applied in
    # forward(), so it is intentionally omitted here.


def _tensorcores_per_chip() -> int:
    # v7x has 2 TensorCores per chip; v5e / v6e expose a single core per device.
    try:
        kind = jax.devices()[0].device_kind.lower()
    except Exception:
        return 1
    return 2 if "v7" in kind else 1


def pam_forward(x, mask, pos, w, b, head, *, num_programs=None):
    B, S, D = x.shape
    assert D % head == 0
    dh = D // head

    # One program per TensorCore: v5e/v6e -> single program over the whole batch
    # (no per-step grid overhead); v7x -> 2 parallel programs, one batch each.
    if num_programs is None:
        num_programs = min(_tensorcores_per_chip(), B)
    if B % num_programs != 0:
        num_programs = 1
    bb = B // num_programs

    def split_heads(a):  # (B, S, D) -> (H, B, S, dh); free layout work in XLA
        return jnp.transpose(a.reshape(B, S, head, dh), (2, 0, 1, 3))

    q = split_heads(pos)                              # q == k == pos
    v = split_heads(x)
    maskf = mask.astype(jnp.float32)                  # (B, S, 1)
    m2 = jnp.einsum('bik,bjk->bij', maskf, maskf)     # (B, S, S) = mask @ mask^T
    wt = jnp.transpose(w).reshape(head, dh, D)        # per-head slices of W^T
    b2 = b.reshape(1, D)

    kernel = functools.partial(pam_kernel, head=head)
    return pl.pallas_call(
        kernel,
        out_shape=jax.ShapeDtypeStruct((B, S, D), x.dtype),
        grid=(num_programs,),
        in_specs=[
            pl.BlockSpec((head, bb, S, dh), lambda bi: (0, bi, 0, 0)),  # q
            pl.BlockSpec((head, bb, S, dh), lambda bi: (0, bi, 0, 0)),  # v
            pl.BlockSpec((bb, S, S), lambda bi: (bi, 0, 0)),            # mask outer
            pl.BlockSpec((head, dh, D), lambda bi: (0, 0, 0)),          # W^T slices
            pl.BlockSpec((1, D), lambda bi: (0, 0)),                    # bias
        ],
        out_specs=pl.BlockSpec((bb, S, D), lambda bi: (bi, 0, 0)),
        compiler_params=pltpu.CompilerParams(
            dimension_semantics=("parallel",)),
    )(q, v, m2, wt, b2)


def pam_reference(x, mask, pos, w, b, head):
    """Pure-JAX transcription of the PyTorch forward, for checking."""
    B, S, D = x.shape
    dh = D // head

    def split(a):  # split_last + transpose(1, 2)
        return jnp.swapaxes(a.reshape(B, S, head, dh), 1, 2)  # (B, H, S, dh)

    q, k, v = split(pos), split(pos), split(x)
    scores = jnp.einsum('bhid,bhjd->bhij', q, k) / dh ** 0.25
    m2 = jnp.einsum('bik,bjk->bij', mask.astype(jnp.float32),
                    mask.astype(jnp.float32)) != 0
    m2 = jnp.broadcast_to(m2[:, None], (B, head, S, S))
    scores = jnp.where(m2, scores, -10000000.0)
    scores = jax.nn.softmax(scores, axis=2)
    scores = jnp.swapaxes(scores, 2, 3)
    v_ = jnp.einsum('bhij,bhjd->bhid', scores, v)
    v_ = jnp.swapaxes(v_, 1, 2).reshape(B, S, D)
    return jnp.maximum(v_ @ w.T + b, 0.0)


if __name__ == "__main__":
    B, S, D, HEAD = 2, 8, 32, 4   # args.emb_dim=32, args.att_head_num=4

    key = jax.random.PRNGKey(0)
    kx, kp, kw, kb = jax.random.split(key, 4)

    x = jax.random.normal(kx, (B, S, D), dtype=jnp.float32)
    pos = jax.random.normal(kp, (B, S, D), dtype=jnp.float32)

    # binary padding mask, (B, S, 1): batch 0 has 8 valid tokens, batch 1 has 5
    lengths = jnp.array([8, 5])
    mask = (jnp.arange(S)[None, :] < lengths[:, None]).astype(jnp.float32)[..., None]

    # deterministic Linear(dim, dim) parameters
    w = jax.random.normal(kw, (D, D), dtype=jnp.float32) * 0.1
    b = jax.random.normal(kb, (D,), dtype=jnp.float32) * 0.1

    out = pam_forward(x, mask, pos, w, b, HEAD)
    out = jax.block_until_ready(out)

    ref = pam_reference(x, mask, pos, w, b, HEAD)
    np.testing.assert_allclose(np.asarray(out), np.asarray(ref),
                               rtol=1e-2, atol=1e-2)

    print("KERNEL_OK")
</pallas_src>

<mosaic_0001>
module attributes {stable_mosaic.version = 11 : i64} {
  func.func @pam_kernel(%arg0: i32, %arg1: memref<4x2x8x8xf32, #tpu.memory_space<vmem>>, %arg2: memref<4x2x8x8xf32, #tpu.memory_space<vmem>>, %arg3: memref<2x8x8xf32, #tpu.memory_space<vmem>>, %arg4: memref<4x8x32xf32, #tpu.memory_space<vmem>>, %arg5: memref<1x32xf32, #tpu.memory_space<vmem>>, %arg6: memref<2x8x32xf32, #tpu.memory_space<vmem>>) attributes {dimension_semantics = [#tpu.dimension_semantics<parallel>], iteration_bounds = array<i64: 1>, scalar_prefetch = 0 : i64, scratch_operands = 0 : i64, tpu.core_type = #tpu.core_type<tc>, window_params = [{transform_indices = @transform_0, window_bounds = array<i64: 4, 2, 8, 8>}, {transform_indices = @transform_1, window_bounds = array<i64: 4, 2, 8, 8>}, {transform_indices = @transform_2, window_bounds = array<i64: 2, 8, 8>}, {pipeline_mode = #tpu.pipeline_mode<synchronous>, transform_indices = @transform_3, window_bounds = array<i64: 4, 8, 32>}, {pipeline_mode = #tpu.pipeline_mode<synchronous>, transform_indices = @transform_4, window_bounds = array<i64: 1, 32>}, {transform_indices = @transform_5, window_bounds = array<i64: 2, 8, 32>}]} {
    %c0 = arith.constant 0 : index
    %c0_0 = arith.constant 0 : index
    %c0_1 = arith.constant 0 : index
    %0 = vector.load %arg3[%c0, %c0_0, %c0_1] : memref<2x8x8xf32, #tpu.memory_space<vmem>>, vector<2x8x8xf32>
    %cst = arith.constant 0.000000e+00 : f32
    %1 = vector.broadcast %cst : f32 to vector<2x8x8xf32>
    %2 = arith.cmpf one, %0, %1 : vector<2x8x8xf32>
    %cst_2 = arith.constant 0.000000e+00 : f32
    %3 = vector.broadcast %cst_2 : f32 to vector<16x32xf32>
    %c0_3 = arith.constant 0 : index
    %c0_4 = arith.constant 0 : index
    %c0_5 = arith.constant 0 : index
    %c0_6 = arith.constant 0 : index
    %4 = vector.load %arg1[%c0_3, %c0_4, %c0_5, %c0_6] : memref<4x2x8x8xf32, #tpu.memory_space<vmem>>, vector<1x2x8x8xf32>
    %5 = vector.shape_cast %4 : vector<1x2x8x8xf32> to vector<2x8x8xf32>
    %c0_7 = arith.constant 0 : index
    %c0_8 = arith.constant 0 : index
    %c0_9 = arith.constant 0 : index
    %c0_10 = arith.constant 0 : index
    %6 = vector.load %arg2[%c0_7, %c0_8, %c0_9, %c0_10] : memref<4x2x8x8xf32, #tpu.memory_space<vmem>>, vector<1x2x8x8xf32>
    %7 = vector.shape_cast %6 : vector<1x2x8x8xf32> to vector<2x8x8xf32>
    "tpu.trace_start"() <{level = 10 : i32, message = "bsd,btd->bst"}> : () -> ()
    %cst_11 = arith.constant dense<0.000000e+00> : vector<2x8x8xf32>
    %8 = tpu.matmul %5, %5, %cst_11 {dimension_numbers = #tpu.dot_dimension_numbers<[2], [2], [1], [1], [0, 0, 0, 1, 1, 1], [0], [0]>} : vector<2x8x8xf32>, vector<2x8x8xf32>, vector<2x8x8xf32> -> vector<2x8x8xf32>
    "tpu.trace_stop"() : () -> ()
    %cst_12 = arith.constant 0.594603539 : f32
    %9 = vector.broadcast %cst_12 : f32 to vector<2x8x8xf32>
    %10 = arith.mulf %8, %9 : vector<2x8x8xf32>
    %cst_13 = arith.constant -1.000000e+07 : f32
    %11 = vector.broadcast %cst_13 : f32 to vector<2x8x8xf32>
    %12 = arith.select %2, %10, %11 : vector<2x8x8xi1>, vector<2x8x8xf32>
    %cst_14 = arith.constant dense<0xFF800000> : vector<2x8xf32>
    %13 = vector.multi_reduction <maximumf>, %12, %cst_14 [2] : vector<2x8x8xf32> to vector<2x8xf32>
    %14 = vector.shape_cast %13 : vector<2x8xf32> to vector<2x8x1xf32>
    %15 = vector.broadcast %14 : vector<2x8x1xf32> to vector<2x8x8xf32>
    %16 = arith.subf %12, %15 : vector<2x8x8xf32>
    %17 = math.exp %16 : vector<2x8x8xf32>
    %cst_15 = arith.constant dense<0.000000e+00> : vector<2x8xf32>
    %18 = vector.multi_reduction <add>, %17, %cst_15 [2] : vector<2x8x8xf32> to vector<2x8xf32>
    %19 = vector.shape_cast %18 : vector<2x8xf32> to vector<2x8x1xf32>
    %20 = tpu.reciprocal %19 {approx = true} : vector<2x8x1xf32> -> vector<2x8x1xf32>
    %21 = vector.broadcast %20 : vector<2x8x1xf32> to vector<2x8x8xf32>
    %22 = arith.mulf %17, %21 : vector<2x8x8xf32>
    "tpu.trace_start"() <{level = 10 : i32, message = "bst,btd->bsd"}> : () -> ()
    %cst_16 = arith.constant dense<0.000000e+00> : vector<2x8x8xf32>
    %23 = tpu.matmul %22, %7, %cst_16 {dimension_numbers = #tpu.dot_dimension_numbers<[2], [1], [1], [2], [0, 0, 0, 1, 1, 2], [0], [0]>} : vector<2x8x8xf32>, vector<2x8x8xf32>, vector<2x8x8xf32> -> vector<2x8x8xf32>
    "tpu.trace_stop"() : () -> ()
    %24 = vector.shape_cast %23 : vector<2x8x8xf32> to vector<16x8xf32>
    %c0_17 = arith.constant 0 : index
    %c0_18 = arith.constant 0 : index
    %c0_19 = arith.constant 0 : index
    %25 = vector.load %arg4[%c0_17, %c0_18, %c0_19] : memref<4x8x32xf32, #tpu.memory_space<vmem>>, vector<1x8x32xf32>
    %26 = vector.shape_cast %25 : vector<1x8x32xf32> to vector<8x32xf32>
    %cst_20 = arith.constant dense<0.000000e+00> : vector<16x32xf32>
    %27 = tpu.matmul %24, %26, %cst_20 {dimension_numbers = #tpu.dot_dimension_numbers<[1], [0], [0], [1], [0, 0, 1, 1], [], []>} : vector<16x8xf32>, vector<8x32xf32>, vector<16x32xf32> -> vector<16x32xf32>
    %28 = arith.addf %3, %27 : vector<16x32xf32>
    %c1 = arith.constant 1 : index
    %c0_21 = arith.constant 0 : index
    %c0_22 = arith.constant 0 : index
    %c0_23 = arith.constant 0 : index
    %29 = vector.load %arg1[%c1, %c0_21, %c0_22, %c0_23] : memref<4x2x8x8xf32, #tpu.memory_space<vmem>>, vector<1x2x8x8xf32>
    %30 = vector.shape_cast %29 : vector<1x2x8x8xf32> to vector<2x8x8xf32>
    %c1_24 = arith.constant 1 : index
    %c0_25 = arith.constant 0 : index
    %c0_26 = arith.constant 0 : index
    %c0_27 = arith.constant 0 : index
    %31 = vector.load %arg2[%c1_24, %c0_25, %c0_26, %c0_27] : memref<4x2x8x8xf32, #tpu.memory_space<vmem>>, vector<1x2x8x8xf32>
    %32 = vector.shape_cast %31 : vector<1x2x8x8xf32> to vector<2x8x8xf32>
    "tpu.trace_start"() <{level = 10 : i32, message = "bsd,btd->bst"}> : () -> ()
    %cst_28 = arith.constant dense<0.000000e+00> : vector<2x8x8xf32>
    %33 = tpu.matmul %30, %30, %cst_28 {dimension_numbers = #tpu.dot_dimension_numbers<[2], [2], [1], [1], [0, 0, 0, 1, 1, 1], [0], [0]>} : vector<2x8x8xf32>, vector<2x8x8xf32>, vector<2x8x8xf32> -> vector<2x8x8xf32>
    "tpu.trace_stop"() : () -> ()
    %cst_29 = arith.constant 0.594603539 : f32
    %34 = vector.broadcast %cst_29 : f32 to vector<2x8x8xf32>
    %35 = arith.mulf %33, %34 : vector<2x8x8xf32>
    %cst_30 = arith.constant -1.000000e+07 : f32
    %36 = vector.broadcast %cst_30 : f32 to vector<2x8x8xf32>
    %37 = arith.select %2, %35, %36 : vector<2x8x8xi1>, vector<2x8x8xf32>
    %cst_31 = arith.constant dense<0xFF800000> : vector<2x8xf32>
    %38 = vector.multi_reduction <maximumf>, %37, %cst_31 [2] : vector<2x8x8xf32> to vector<2x8xf32>
    %39 = vector.shape_cast %38 : vector<2x8xf32> to vector<2x8x1xf32>
    %40 = vector.broadcast %39 : vector<2x8x1xf32> to vector<2x8x8xf32>
    %41 = arith.subf %37, %40 : vector<2x8x8xf32>
    %42 = math.exp %41 : vector<2x8x8xf32>
    %cst_32 = arith.constant dense<0.000000e+00> : vector<2x8xf32>
    %43 = vector.multi_reduction <add>, %42, %cst_32 [2] : vector<2x8x8xf32> to vector<2x8xf32>
    %44 = vector.shape_cast %43 : vector<2x8xf32> to vector<2x8x1xf32>
    %45 = tpu.reciprocal %44 {approx = true} : vector<2x8x1xf32> -> vector<2x8x1xf32>
    %46 = vector.broadcast %45 : vector<2x8x1xf32> to vector<2x8x8xf32>
    %47 = arith.mulf %42, %46 : vector<2x8x8xf32>
    "tpu.trace_start"() <{level = 10 : i32, message = "bst,btd->bsd"}> : () -> ()
    %cst_33 = arith.constant dense<0.000000e+00> : vector<2x8x8xf32>
    %48 = tpu.matmul %47, %32, %cst_33 {dimension_numbers = #tpu.dot_dimension_numbers<[2], [1], [1], [2], [0, 0, 0, 1, 1, 2], [0], [0]>} : vector<2x8x8xf32>, vector<2x8x8xf32>, vector<2x8x8xf32> -> vector<2x8x8xf32>
    "tpu.trace_stop"() : () -> ()
    %49 = vector.shape_cast %48 : vector<2x8x8xf32> to vector<16x8xf32>
    %c1_34 = arith.constant 1 : index
    %c0_35 = arith.constant 0 : index
    %c0_36 = arith.constant 0 : index
    %50 = vector.load %arg4[%c1_34, %c0_35, %c0_36] : memref<4x8x32xf32, #tpu.memory_space<vmem>>, vector<1x8x32xf32>
    %51 = vector.shape_cast %50 : vector<1x8x32xf32> to vector<8x32xf32>
    %cst_37 = arith.constant dense<0.000000e+00> : vector<16x32xf32>
    %52 = tpu.matmul %49, %51, %cst_37 {dimension_numbers = #tpu.dot_dimension_numbers<[1], [0], [0], [1], [0, 0, 1, 1], [], []>} : vector<16x8xf32>, vector<8x32xf32>, vector<16x32xf32> -> vector<16x32xf32>
    %53 = arith.addf %28, %52 : vector<16x32xf32>
    %c2 = arith.constant 2 : index
    %c0_38 = arith.constant 0 : index
    %c0_39 = arith.constant 0 : index
    %c0_40 = arith.constant 0 : index
    %54 = vector.load %arg1[%c2, %c0_38, %c0_39, %c0_40] : memref<4x2x8x8xf32, #tpu.memory_space<vmem>>, vector<1x2x8x8xf32>
    %55 = vector.shape_cast %54 : vector<1x2x8x8xf32> to vector<2x8x8xf32>
    %c2_41 = arith.constant 2 : index
    %c0_42 = arith.constant 0 : index
    %c0_43 = arith.constant 0 : index
    %c0_44 = arith.constant 0 : index
    %56 = vector.load %arg2[%c2_41, %c0_42, %c0_43, %c0_44] : memref<4x2x8x8xf32, #tpu.memory_space<vmem>>, vector<1x2x8x8xf32>
    %57 = vector.shape_cast %56 : vector<1x2x8x8xf32> to vector<2x8x8xf32>
    "tpu.trace_start"() <{level = 10 : i32, message = "bsd,btd->bst"}> : () -> ()
    %cst_45 = arith.constant dense<0.000000e+00> : vector<2x8x8xf32>
    %58 = tpu.matmul %55, %55, %cst_45 {dimension_numbers = #tpu.dot_dimension_numbers<[2], [2], [1], [1], [0, 0, 0, 1, 1, 1], [0], [0]>} : vector<2x8x8xf32>, vector<2x8x8xf32>, vector<2x8x8xf32> -> vector<2x8x8xf32>
    "tpu.trace_stop"() : () -> ()
    %cst_46 = arith.constant 0.594603539 : f32
    %59 = vector.broadcast %cst_46 : f32 to vector<2x8x8xf32>
    %60 = arith.mulf %58, %59 : vector<2x8x8xf32>
    %cst_47 = arith.constant -1.000000e+07 : f32
    %61 = vector.broadcast %cst_47 : f32 to vector<2x8x8xf32>
    %62 = arith.select %2, %60, %61 : vector<2x8x8xi1>, vector<2x8x8xf32>
    %cst_48 = arith.constant dense<0xFF800000> : vector<2x8xf32>
    %63 = vector.multi_reduction <maximumf>, %62, %cst_48 [2] : vector<2x8x8xf32> to vector<2x8xf32>
    %64 = vector.shape_cast %63 : vector<2x8xf32> to vector<2x8x1xf32>
    %65 = vector.broadcast %64 : vector<2x8x1xf32> to vector<2x8x8xf32>
    %66 = arith.subf %62, %65 : vector<2x8x8xf32>
    %67 = math.exp %66 : vector<2x8x8xf32>
    %cst_49 = arith.constant dense<0.000000e+00> : vector<2x8xf32>
    %68 = vector.multi_reduction <add>, %67, %cst_49 [2] : vector<2x8x8xf32> to vector<2x8xf32>
    %69 = vector.shape_cast %68 : vector<2x8xf32> to vector<2x8x1xf32>
    %70 = tpu.reciprocal %69 {approx = true} : vector<2x8x1xf32> -> vector<2x8x1xf32>
    %71 = vector.broadcast %70 : vector<2x8x1xf32> to vector<2x8x8xf32>
    %72 = arith.mulf %67, %71 : vector<2x8x8xf32>
    "tpu.trace_start"() <{level = 10 : i32, message = "bst,btd->bsd"}> : () -> ()
    %cst_50 = arith.constant dense<0.000000e+00> : vector<2x8x8xf32>
    %73 = tpu.matmul %72, %57, %cst_50 {dimension_numbers = #tpu.dot_dimension_numbers<[2], [1], [1], [2], [0, 0, 0, 1, 1, 2], [0], [0]>} : vector<2x8x8xf32>, vector<2x8x8xf32>, vector<2x8x8xf32> -> vector<2x8x8xf32>
    "tpu.trace_stop"() : () -> ()
    %74 = vector.shape_cast %73 : vector<2x8x8xf32> to vector<16x8xf32>
    %c2_51 = arith.constant 2 : index
    %c0_52 = arith.constant 0 : index
    %c0_53 = arith.constant 0 : index
    %75 = vector.load %arg4[%c2_51, %c0_52, %c0_53] : memref<4x8x32xf32, #tpu.memory_space<vmem>>, vector<1x8x32xf32>
    %76 = vector.shape_cast %75 : vector<1x8x32xf32> to vector<8x32xf32>
    %cst_54 = arith.constant dense<0.000000e+00> : vector<16x32xf32>
    %77 = tpu.matmul %74, %76, %cst_54 {dimension_numbers = #tpu.dot_dimension_numbers<[1], [0], [0], [1], [0, 0, 1, 1], [], []>} : vector<16x8xf32>, vector<8x32xf32>, vector<16x32xf32> -> vector<16x32xf32>
    %78 = arith.addf %53, %77 : vector<16x32xf32>
    %c3 = arith.constant 3 : index
    %c0_55 = arith.constant 0 : index
    %c0_56 = arith.constant 0 : index
    %c0_57 = arith.constant 0 : index
    %79 = vector.load %arg1[%c3, %c0_55, %c0_56, %c0_57] : memref<4x2x8x8xf32, #tpu.memory_space<vmem>>, vector<1x2x8x8xf32>
    %80 = vector.shape_cast %79 : vector<1x2x8x8xf32> to vector<2x8x8xf32>
    %c3_58 = arith.constant 3 : index
    %c0_59 = arith.constant 0 : index
    %c0_60 = arith.constant 0 : index
    %c0_61 = arith.constant 0 : index
    %81 = vector.load %arg2[%c3_58, %c0_59, %c0_60, %c0_61] : memref<4x2x8x8xf32, #tpu.memory_space<vmem>>, vector<1x2x8x8xf32>
    %82 = vector.shape_cast %81 : vector<1x2x8x8xf32> to vector<2x8x8xf32>
    "tpu.trace_start"() <{level = 10 : i32, message = "bsd,btd->bst"}> : () -> ()
    %cst_62 = arith.constant dense<0.000000e+00> : vector<2x8x8xf32>
    %83 = tpu.matmul %80, %80, %cst_62 {dimension_numbers = #tpu.dot_dimension_numbers<[2], [2], [1], [1], [0, 0, 0, 1, 1, 1], [0], [0]>} : vector<2x8x8xf32>, vector<2x8x8xf32>, vector<2x8x8xf32> -> vector<2x8x8xf32>
    "tpu.trace_stop"() : () -> ()
    %cst_63 = arith.constant 0.594603539 : f32
    %84 = vector.broadcast %cst_63 : f32 to vector<2x8x8xf32>
    %85 = arith.mulf %83, %84 : vector<2x8x8xf32>
    %cst_64 = arith.constant -1.000000e+07 : f32
    %86 = vector.broadcast %cst_64 : f32 to vector<2x8x8xf32>
    %87 = arith.select %2, %85, %86 : vector<2x8x8xi1>, vector<2x8x8xf32>
    %cst_65 = arith.constant dense<0xFF800000> : vector<2x8xf32>
    %88 = vector.multi_reduction <maximumf>, %87, %cst_65 [2] : vector<2x8x8xf32> to vector<2x8xf32>
    %89 = vector.shape_cast %88 : vector<2x8xf32> to vector<2x8x1xf32>
    %90 = vector.broadcast %89 : vector<2x8x1xf32> to vector<2x8x8xf32>
    %91 = arith.subf %87, %90 : vector<2x8x8xf32>
    %92 = math.exp %91 : vector<2x8x8xf32>
    %cst_66 = arith.constant dense<0.000000e+00> : vector<2x8xf32>
    %93 = vector.multi_reduction <add>, %92, %cst_66 [2] : vector<2x8x8xf32> to vector<2x8xf32>
    %94 = vector.shape_cast %93 : vector<2x8xf32> to vector<2x8x1xf32>
    %95 = tpu.reciprocal %94 {approx = true} : vector<2x8x1xf32> -> vector<2x8x1xf32>
    %96 = vector.broadcast %95 : vector<2x8x1xf32> to vector<2x8x8xf32>
    %97 = arith.mulf %92, %96 : vector<2x8x8xf32>
    "tpu.trace_start"() <{level = 10 : i32, message = "bst,btd->bsd"}> : () -> ()
    %cst_67 = arith.constant dense<0.000000e+00> : vector<2x8x8xf32>
    %98 = tpu.matmul %97, %82, %cst_67 {dimension_numbers = #tpu.dot_dimension_numbers<[2], [1], [1], [2], [0, 0, 0, 1, 1, 2], [0], [0]>} : vector<2x8x8xf32>, vector<2x8x8xf32>, vector<2x8x8xf32> -> vector<2x8x8xf32>
    "tpu.trace_stop"() : () -> ()
    %99 = vector.shape_cast %98 : vector<2x8x8xf32> to vector<16x8xf32>
    %c3_68 = arith.constant 3 : index
    %c0_69 = arith.constant 0 : index
    %c0_70 = arith.constant 0 : index
    %100 = vector.load %arg4[%c3_68, %c0_69, %c0_70] : memref<4x8x32xf32, #tpu.memory_space<vmem>>, vector<1x8x32xf32>
    %101 = vector.shape_cast %100 : vector<1x8x32xf32> to vector<8x32xf32>
    %cst_71 = arith.constant dense<0.000000e+00> : vector<16x32xf32>
    %102 = tpu.matmul %99, %101, %cst_71 {dimension_numbers = #tpu.dot_dimension_numbers<[1], [0], [0], [1], [0, 0, 1, 1], [], []>} : vector<16x8xf32>, vector<8x32xf32>, vector<16x32xf32> -> vector<16x32xf32>
    %103 = arith.addf %78, %102 : vector<16x32xf32>
    %c0_72 = arith.constant 0 : index
    %c0_73 = arith.constant 0 : index
    %104 = vector.load %arg5[%c0_72, %c0_73] : memref<1x32xf32, #tpu.memory_space<vmem>>, vector<1x32xf32>
    %105 = vector.broadcast %104 : vector<1x32xf32> to vector<16x32xf32>
    %106 = arith.addf %103, %105 : vector<16x32xf32>
    %cst_74 = arith.constant 0.000000e+00 : f32
    %107 = vector.broadcast %cst_74 : f32 to vector<16x32xf32>
    %108 = arith.maximumf %106, %107 : vector<16x32xf32>
    %109 = vector.shape_cast %108 : vector<16x32xf32> to vector<2x8x32xf32>
    %c0_75 = arith.constant 0 : index
    %c0_76 = arith.constant 0 : index
    %c0_77 = arith.constant 0 : index
    %110 = vector.load %arg6[%c0_75, %c0_76, %c0_77] : memref<2x8x32xf32, #tpu.memory_space<vmem>>, vector<2x8x32xf32>
    tpu.vector_store %arg6[%c0_75, %c0_76, %c0_77], %109 {strides = array<i32>} : memref<2x8x32xf32, #tpu.memory_space<vmem>>, vector<2x8x32xf32>,
    return
  }
  func.func @transform_0(%arg0: i32) -> (i32, i32, i32, i32) {
    %c0_i32 = arith.constant 0 : i32
    %c0_i32_0 = arith.constant 0 : i32
    %c0_i32_1 = arith.constant 0 : i32
    %c0_i32_2 = arith.constant 0 : i32
    return %c0_i32, %arg0, %c0_i32_0, %c0_i32_1 : i32, i32, i32, i32
  }
  func.func @transform_1(%arg0: i32) -> (i32, i32, i32, i32) {
    %c0_i32 = arith.constant 0 : i32
    %c0_i32_0 = arith.constant 0 : i32
    %c0_i32_1 = arith.constant 0 : i32
    %c0_i32_2 = arith.constant 0 : i32
    return %c0_i32, %arg0, %c0_i32_0, %c0_i32_1 : i32, i32, i32, i32
  }
  func.func @transform_2(%arg0: i32) -> (i32, i32, i32) {
    %c0_i32 = arith.constant 0 : i32
    %c0_i32_0 = arith.constant 0 : i32
    %c0_i32_1 = arith.constant 0 : i32
    return %arg0, %c0_i32, %c0_i32_0 : i32, i32, i32
  }
  func.func @transform_3(%arg0: i32) -> (i32, i32, i32) {
    %c0_i32 = arith.constant 0 : i32
    %c0_i32_0 = arith.constant 0 : i32
    %c0_i32_1 = arith.constant 0 : i32
    %c0_i32_2 = arith.constant 0 : i32
    return %c0_i32, %c0_i32_0, %c0_i32_1 : i32, i32, i32
  }
  func.func @transform_4(%arg0: i32) -> (i32, i32) {
    %c0_i32 = arith.constant 0 : i32
    %c0_i32_0 = arith.constant 0 : i32
    %c0_i32_1 = arith.constant 0 : i32
    return %c0_i32, %c0_i32_0 : i32, i32
  }
  func.func @transform_5(%arg0: i32) -> (i32, i32, i32) {
    %c0_i32 = arith.constant 0 : i32
    %c0_i32_0 = arith.constant 0 : i32
    %c0_i32_1 = arith.constant 0 : i32
    return %arg0, %c0_i32, %c0_i32_0 : i32, i32, i32
  }
}

</mosaic_0001>

<bundles_post_ra>
// kernel: tpu_custom_call.1
= control target key start
LH: loop header
LB: loop body
LE: loop exit
PB: predicated region body
PF: predicated region fallthrough
CT: control target
= control target key end

     0   :  { %10 = vsyncpa [#allocation3], 0  ;;  %s2271_s0 = inlined_call_operand.hbm [shape: f32[4,2,8,8], index: 0, kind: input, shape index: {}]   ;;  %s2272_s1 = inlined_call_operand.hbm [shape: f32[4,2,8,8], index: 1, kind: input, shape index: {}]   ;;  %s2273_s2 = inlined_call_operand.hbm [shape: f32[2,8,8], index: 2, kind: input, shape index: {}]   ;;  %s2274_s3 = inlined_call_operand.hbm [shape: f32[4,8,32], index: 3, kind: input, shape index: {}]   ;;  %s2275_s4 = inlined_call_operand.vmem [shape: f32[1,32], index: 4, kind: input, shape index: {}]   ;;  %s2276_s5 = inlined_call_operand.hbm [shape: f32[2,8,32], index: 5, kind: output, shape index: {}]  }
   0x1   :  { %11 = vsyncpa [#allocation6], 0 }
   0x2   :  { %12 = vsyncpa [#allocation9], 0 }
   0x3   :  { %13 = vsyncpa [#allocation4], 0  ;;  %s2069_s18 = smov [#allocation5]   ;;  %s2070_s20 = smov [#allocation2]  }
   0x4   :  { %s31_s19 = sshll.u32 %s2069_s18, 4  ;;  %s19_s21 = sshll.u32 %s2070_s20, 4  ;;  %s32_s19 = int_to_ptr.vmem [resolvable:$true] %s31_s19  ;;  %s20_s21 = int_to_ptr.vmem [resolvable:$true] %s19_s21 }
   0x5   :  { %s1969_s22 = scalar_lea.vmem %s32_s19, 1024  ;;  %p1974_p1 = scmp.lt.s32.totalorder %s32_s19, %s32_s19 }
   0x6   :  { %p1970_p0 = scmp.ne.s32.totalorder %s32_s19, %s1969_s22  ;;  %p1975_p2 = scmp.lt.s32.totalorder %s1969_s22, %s1969_s22 }
   0x8   :  { %p1976_p3 = por %p1975_p2, %p1974_p1 }
   0xa   :  { %p1977_p4 = pnand %p1976_p3, %p1970_p0 }
   0xc   :  { %1980 = shalt.err (!%p1977_p4)
}
   0xd   :  { %s2071_s23 = smov 128   ;;  %s2072_s24 = smov 8  }
   0xe   :  { %37 = dma.hbm_to_vmem [thread:$0]  %s2272_s1, 1024, %s32_s19, [#allocation6], %s2071_s23, %s2071_s23, %s2072_s24  }
   0xf   :  { %s1989_s27 = scalar_lea.vmem %s20_s21, 1024  ;;  %p1994_p6 = scmp.lt.s32.totalorder %s20_s21, %s20_s21 }
  0x10   :  { %p1990_p5 = scmp.ne.s32.totalorder %s20_s21, %s1989_s27  ;;  %p1995_p7 = scmp.lt.s32.totalorder %s1989_s27, %s1989_s27 }
  0x12   :  { %p1996_p8 = por %p1995_p7, %p1994_p6 }
  0x14   :  { %p1997_p9 = pnand %p1996_p8, %p1990_p5 }
  0x16   :  { %2000 = shalt.err (!%p1997_p9)
}
  0x17   :  { %25 = dma.hbm_to_vmem [thread:$0]  %s2271_s0, 1024, %s20_s21, [#allocation3], %s2071_s23, %s2071_s23, %s2072_s24  }
  0x18   :  { %s2073_s30 = smov [#allocation7]   ;;  %s2074_s7 = smov [#allocation8]  }
  0x19   :  { %s43_s6 = sshll.u32 %s2073_s30, 4  ;;  %s55_s8 = sshll.u32 %s2074_s7, 4  ;;  %s44_s6 = int_to_ptr.vmem [resolvable:$true] %s43_s6  ;;  %s56_s8 = int_to_ptr.vmem [resolvable:$true] %s55_s8 }
  0x1a   :  { %s2009_s1 = scalar_lea.vmem %s44_s6, 256  ;;  %p2014_p11 = scmp.lt.s32.totalorder %s44_s6, %s44_s6 }
  0x1b   :  { %p2010_p10 = scmp.ne.s32.totalorder %s44_s6, %s2009_s1  ;;  %p2015_p12 = scmp.lt.s32.totalorder %s2009_s1, %s2009_s1 }
  0x1d   :  { %p2016_p13 = por %p2015_p12, %p2014_p11 }
  0x1f   :  { %p2017_p0 = pnand %p2016_p13, %p2010_p10 }
  0x21   :  { %2020 = shalt.err (!%p2017_p0)
}
  0x22   :  { %49 = dma.hbm_to_vmem [thread:$0]  %s2273_s2, 256, %s44_s6, [#allocation6], %s2071_s23, %s2071_s23, %s2072_s24  }
  0x23   :  { %s2029_s0 = scalar_lea.vmem %s56_s8, 512  ;;  %p2034_p2 = scmp.lt.s32.totalorder %s56_s8, %s56_s8 }
  0x24   :  { %p2030_p1 = scmp.ne.s32.totalorder %s56_s8, %s2029_s0  ;;  %p2035_p3 = scmp.lt.s32.totalorder %s2029_s0, %s2029_s0 }
  0x26   :  { %p2036_p4 = por %p2035_p3, %p2034_p2 }
  0x28   :  { %p2037_p5 = pnand %p2036_p4, %p2030_p1 }
  0x2a   :  { %2040 = shalt.err (!%p2037_p5)
}
  0x2b   :  { %61 = dma.hbm_to_vmem [thread:$0]  %s2274_s3, 512, %s56_s8, [#allocation9], %s2071_s23, %s2071_s23, %s2072_s24  }
  0x2c   :  { %2061 = dma.done.wait [#allocation3], 1024  }
  0x2d   :  { %2062 = vsyncadd [#allocation3], 4294966272 }
  0x2e   :  { %2063 = dma.done.wait [#allocation6], 1280  }
  0x2f   :  { %2064 = vsyncadd [#allocation6], 4294966016 }
  0x30   :  { %2065 = dma.done.wait [#allocation9], 512  }
  0x31   :  { %2066 = vsyncadd [#allocation9], 4294966784  ;;  %v2075_v0 = vmov 0.0   ;;  %vm2076_vm0 = vmmov 0   ;;  %vm84_vm1 = vcmask 64512   ;;  %v80_v1 = vld [vmem:[#allocation2] sm:$0xff] }
  0x32   :  { %1820 = vmatprep.subr.mxu0 %v2075_v0  ;;  %1825 = vmatprep.subr.mxu1 %v2075_v0  ;;  %v81_v2 = vld [vmem:[#allocation2 + $0x8] sm:$0xff]  ;;  %v2148_v3 = vld [vmem:[#allocation7] sm:$0xff]  ;;  %v405_v31 = vld [vmem:[#allocation2 + $0x10] sm:$0xff]  ;;  %vm1721_vm4 = vcmask 261120   ;;  %s2077_s13 = smov [#allocation10]  }
  0x33   :  { %1822 = vmatprep.mubr.msk.f32.mxu0 %vm2076_vm0, %v2075_v0  ;;  %1827 = vmatprep.mubr.msk.f32.mxu1 %vm2076_vm0, %v2075_v0  ;;  %v2150_v4 = vld [vmem:[#allocation7 + $0x8] sm:$0xff]  ;;  %vm78_vm2 = vcmp.ne.f32.partialorder %v2148_v3, 0.0  ;;  %v82_v25 = vld [vmem:[#allocation5] sm:$0xff]  ;;  %v406_v34 = vld [vmem:[#allocation2 + $0x18] sm:$0xff]  ;;  %s1729_s14 = sshll.u32 %s2077_s13, 4  ;;  %s1730_s14 = int_to_ptr.vmem [resolvable:$true] %s1729_s14 }
  0x34   :  { %1821 = vmatpush3.xpose.msk.msra.mxu0 %vm84_vm1, %v80_v1  ;;  %1826 = vmatpush3.xpose.msk.msra.mxu1 %vm84_vm1, %v81_v2  ;;  %vm79_vm3 = vcmp.ne.f32.partialorder %v2150_v4, 0.0  ;;  %v83_v26 = vld [vmem:[#allocation5 + $0x8] sm:$0xff]  ;;  %v408_v59 = vld [vmem:[#allocation5 + $0x10] sm:$0xff]  ;;  %v409_v60 = vld [vmem:[#allocation5 + $0x18] sm:$0xff]  ;;  %s2041_s15 = scalar_lea.vmem %s1730_s14, 256  ;;  %p2046_p7 = scmp.lt.s32.totalorder %s1730_s14, %s1730_s14 }
  0x35   :  { %1830 = vmatprep.subr.mxu0 %v2075_v0  ;;  %1835 = vmatprep.subr.mxu1 %v2075_v0  ;;  %v403_v61 = vld [vmem:[#allocation8] sm:$0xff]  ;;  %p2042_p6 = scmp.ne.s32.totalorder %s1730_s14, %s2041_s15  ;;  %p2047_p8 = scmp.lt.s32.totalorder %s2041_s15, %s2041_s15 }
  0x36   :  { %v1305_v3 = vld [vmem:[#allocation5 + $0x30] sm:$0xff] }
  0x37   :  { %1823 = vmatmul.mubr.msk.f32.vlgmr.msra.gmra.mxu0 %vm84_vm1, %v80_v1  ;;  %1828 = vmatmul.mubr.msk.f32.vlgmr.msra.gmra.mxu1 %vm84_vm1, %v81_v2  ;;  %p2048_p9 = por %p2047_p8, %p2046_p7 }
  0x38   :  { %1832 = vmatprep.mubr.msk.f32.mxu0 %vm2076_vm0, %v2075_v0  ;;  %1837 = vmatprep.mubr.msk.f32.mxu1 %vm2076_vm0, %v2075_v0 }
  0x39   :  { %1831 = vmatpush3.msra.mxu0 %v82_v25  ;;  %1836 = vmatpush3.msra.mxu1 %v83_v26  ;;  %v897_v26 = vld [vmem:[#allocation5 + $0x28] sm:$0xff]  ;;  %p2049_p10 = pnand %p2048_p9, %p2042_p6 }
  0x3a   :  { %1840 = vmatprep.subr.mxu0 %v2075_v0  ;;  %1845 = vmatprep.subr.mxu1 %v2075_v0 }
  0xf7   :  { %v154_v5 = vpop.f32.mrf.mxu0  ;;  %v227_v6 = vpop.f32.mrf.mxu1 }
  0xf8   :  { %v231_v7 = vmul.f32 0.59460354, %v154_v5  ;;  %v232_v8 = vmul.f32 0.59460354, %v227_v6 }
  0xf9   :  { %v1824_v9 = vpop.f32.mrf.mxu0  ;;  %v1829_v10 = vpop.f32.mrf.mxu1 }
  0xfa   :  { %v233_v11 = vsel %vm78_vm2, %v231_v7, -10000000.0  ;;  %v234_v12 = vsel %vm79_vm3, %v232_v8, -10000000.0  ;;  %v894_v7 = vld [vmem:[#allocation2 + $0x28] sm:$0xff]  ;;  %v729_v8 = vld [vmem:[#allocation8 + $0x8] sm:$0xff] }
  0xfb   :  { %v235_v13 = vsel %vm84_vm1, %v233_v11, -inf  ;;  %v238_v14 = vsel %vm84_vm1, %v234_v12, -inf }
  0xfc   :  { %236 = vmax.xlane.f32.xlu0 %v235_v13 }
 0x100   :  { %239 = vmax.xlane.f32.xlu0 %v238_v14 }
 0x185   :  { %v237_v15 = vpop.xlane.xlu0 %236 }
 0x186   :  { %v241_v16 = vsub.f32 %v233_v11, %v237_v15  ;;  %v893_v11 = vld [vmem:[#allocation2 + $0x20] sm:$0xff] }
 0x188   :  { %v243_v17 = vmul.f32 1.442695, %v241_v16 }
 0x189   :  { %v240_v18 = vpop.xlane.xlu0 %239 }
 0x18a   :  { %1929 = vpow2.f32 %v243_v17  ;;  %v242_v19 = vsub.f32 %v234_v12, %v240_v18 }
 0x18c   :  { %v245_v20 = vmul.f32 1.442695, %v242_v19 }
 0x18e   :  { %1931 = vpow2.f32 %v245_v20 }
 0x197   :  { %v1930_v21 = vpop.eup %1929 }
 0x198   :  { %v247_v22 = vsel %vm84_vm1, %v1930_v21, 0.0 }
 0x199   :  { %248 = vadd.xlane.f32.xlu1 %v247_v22 }
 0x19b   :  { %v1932_v23 = vpop.eup %1931 }
 0x19c   :  { %v250_v24 = vsel %vm84_vm1, %v1932_v23, 0.0 }
 0x19d   :  { %251 = vadd.xlane.f32.xlu1 %v250_v24 }
 0x222   :  { %v249_v27 = vpop.xlane.xlu1 %248 }
 0x223   :  { %1933 = vrcp.f32 %v249_v27 }
 0x226   :  { %v252_v28 = vpop.xlane.xlu1 %251 }
 0x227   :  { %1935 = vrcp.f32 %v252_v28 }
 0x230   :  { %v1934_v29 = vpop.eup %1933 }
 0x231   :  { %v255_v30 = vmul.f32 %v1934_v29, %v1930_v21 }
 0x233   :  { %1833 = vmatmul.mubr.msk.f32.vlgmr.msra.gmra.mxu0 %vm84_vm1, %v255_v30 }
 0x234   :  { %v1936_v32 = vpop.eup %1935  ;;  %1841 = vmatpush3.xpose.msk.msra.mxu0 %vm84_vm1, %v405_v31  ;;  %1842 = vmatprep.mubr.msk.f32.mxu0 %vm2076_vm0, %v2075_v0 }
 0x235   :  { %v256_v33 = vmul.f32 %v1936_v32, %v1932_v23  ;;  %1850 = vmatprep.subr.mxu0 %v2075_v0 }
 0x237   :  { %1838 = vmatmul.mubr.msk.f32.vlgmr.msra.gmra.mxu1 %vm84_vm1, %v256_v33  ;;  %1843 = vmatmul.mubr.msk.f32.vlgmr.msra.gmra.mxu0 %vm84_vm1, %v405_v31 }
 0x238   :  { %1846 = vmatpush3.xpose.msk.msra.mxu1 %vm84_vm1, %v406_v34  ;;  %1847 = vmatprep.mubr.msk.f32.mxu1 %vm2076_vm0, %v2075_v0 }
 0x239   :  { %1852 = vmatprep.mubr.msk.f32.mxu0 %vm2076_vm0, %v2075_v0  ;;  %1855 = vmatprep.subr.mxu1 %v2075_v0 }
 0x23a   :  { %1851 = vmatpush3.msra.mxu0 %v408_v59 }
 0x23b   :  { %1848 = vmatmul.mubr.msk.f32.vlgmr.msra.gmra.mxu1 %vm84_vm1, %v406_v34  ;;  %1860 = vmatprep.subr.mxu0 %v729_v8 }
 0x23c   :  { %1857 = vmatprep.mubr.msk.f32.mxu1 %vm2076_vm0, %v2075_v0  ;;  %1856 = vmatpush3.msra.mxu1 %v409_v60 }
 0x23d   :  { %1865 = vmatprep.subr.mxu1 %v403_v61 }
 0x2f3   :  { %v326_v35 = vpop.f32.mrf.mxu0 }
 0x2f5   :  { %v1834_v36 = vpop.f32.mrf.mxu0 }
 0x2f7   :  { %v399_v37 = vpop.f32.mrf.mxu1  ;;  %v479_v38 = vpop.f32.mrf.mxu0 }
 0x2f8   :  { %v556_v39 = vmul.f32 0.59460354, %v479_v38 }
 0x2f9   :  { %v1839_v40 = vpop.f32.mrf.mxu1  ;;  %v1844_v41 = vpop.f32.mrf.mxu0 }
 0x2fa   :  { %v558_v42 = vsel %vm78_vm2, %v556_v39, -10000000.0 }
 0x2fb   :  { %v552_v43 = vpop.f32.mrf.mxu1  ;;  %v560_v44 = vsel %vm84_vm1, %v558_v42, -inf }
 0x2fc   :  { %v557_v45 = vmul.f32 0.59460354, %v552_v43  ;;  %561 = vmax.xlane.f32.xlu0 %v560_v44  ;;  %v896_v43 = vld [vmem:[#allocation5 + $0x20] sm:$0xff] }
 0x2fd   :  { %v1849_v46 = vpop.f32.mrf.mxu1  ;;  %v1217_v44 = vld [vmem:[#allocation8 + $0x10] sm:$0xff] }
 0x2fe   :  { %v559_v47 = vsel %vm79_vm3, %v557_v45, -10000000.0 }
 0x2ff   :  { %v563_v48 = vsel %vm84_vm1, %v559_v47, -inf }
 0x300   :  { %564 = vmax.xlane.f32.xlu1 %v563_v48 }
 0x385   :  { %v562_v49 = vpop.xlane.xlu0 %561 }
 0x386   :  { %v566_v50 = vsub.f32 %v558_v42, %v562_v49 }
 0x388   :  { %v568_v51 = vmul.f32 1.442695, %v566_v50 }
 0x389   :  { %v565_v52 = vpop.xlane.xlu1 %564 }
 0x38a   :  { %1937 = vpow2.f32 %v568_v51  ;;  %v567_v53 = vsub.f32 %v559_v47, %v565_v52 }
 0x38c   :  { %v570_v54 = vmul.f32 1.442695, %v567_v53 }
 0x38e   :  { %1939 = vpow2.f32 %v570_v54 }
 0x397   :  { %v1938_v55 = vpop.eup %1937 }
 0x398   :  { %v572_v56 = vsel %vm84_vm1, %v1938_v55, 0.0 }
 0x399   :  { %573 = vadd.xlane.f32.xlu0 %v572_v56 }
 0x39b   :  { %v1940_v57 = vpop.eup %1939 }
 0x39c   :  { %v575_v58 = vsel %vm84_vm1, %v1940_v57, 0.0 }
 0x39d   :  { %576 = vadd.xlane.f32.xlu1 %v575_v58 }
 0x422   :  { %v574_v62 = vpop.xlane.xlu0 %573 }
 0x423   :  { %1941 = vrcp.f32 %v574_v62 }
 0x426   :  { %v577_v63 = vpop.xlane.xlu1 %576 }
 0x427   :  { %1943 = vrcp.f32 %v577_v63 }
 0x430   :  { %v1942_v1 = vpop.eup %1941 }
 0x431   :  { %v580_v2 = vmul.f32 %v1942_v1, %v1938_v55 }
 0x433   :  { %1853 = vmatmul.mubr.msk.f32.vlgmr.msra.gmra.mxu0 %vm84_vm1, %v580_v2 }
 0x434   :  { %v1944_v5 = vpop.eup %1943  ;;  %1861 = vmatpush3.msra.mxu0 %v729_v8 }
 0x435   :  { %v581_v6 = vmul.f32 %v1944_v5, %v1940_v57  ;;  %1870 = vmatprep.subr.mxu0 %v2075_v0 }
 0x437   :  { %1858 = vmatmul.mubr.msk.f32.vlgmr.msra.gmra.mxu1 %vm84_vm1, %v581_v6 }
 0x438   :  { %1867 = vmatprep.mubr.msk.f32.mxu1 %vm84_vm1, %v326_v35  ;;  %1866 = vmatpush3.msra.mxu1 %v403_v61  ;;  %v1303_v61 = vld [vmem:[#allocation2 + $0x38] sm:$0xff] }
 0x439   :  { %1875 = vmatprep.subr.mxu1 %v2075_v0 }
 0x43b   :  { %1868 = vmatmul.mubr.msk.f32.vlgmr.msra.gmra.mxu1 %vm84_vm1, %v399_v37  ;;  %v1302_v37 = vld [vmem:[#allocation2 + $0x30] sm:$0xff] }
 0x43c   :  { %1876 = vmatpush3.xpose.msk.msra.mxu1 %vm84_vm1, %v894_v7  ;;  %1877 = vmatprep.mubr.msk.f32.mxu1 %vm2076_vm0, %v2075_v0 }
 0x43d   :  { %1885 = vmatprep.subr.mxu1 %v2075_v0 }
 0x43f   :  { %1878 = vmatmul.mubr.msk.f32.vlgmr.msra.gmra.mxu1 %vm84_vm1, %v894_v7 }
 0x440   :  { %1887 = vmatprep.mubr.msk.f32.mxu1 %vm2076_vm0, %v2075_v0  ;;  %1886 = vmatpush3.msra.mxu1 %v897_v26 }
 0x441   :  { %1895 = vmatprep.subr.mxu1 %v2075_v0 }
 0x4f3   :  { %v651_v9 = vpop.f32.mrf.mxu0 }
 0x4f4   :  { %1862 = vmatprep.mubr.msk.f32.mxu0 %vm84_vm1, %v651_v9 }
 0x4f5   :  { %v1854_v10 = vpop.f32.mrf.mxu0 }
 0x4f7   :  { %v724_v12 = vpop.f32.mrf.mxu1 }
 0x4f8   :  { %1863 = vmatmul.mubr.msk.f32.vlgmr.msra.gmra.mxu0 %vm84_vm1, %v724_v12 }
 0x4f9   :  { %1871 = vmatpush3.xpose.msk.msra.mxu0 %vm84_vm1, %v893_v11  ;;  %v1859_v13 = vpop.f32.mrf.mxu1  ;;  %1872 = vmatprep.mubr.msk.f32.mxu0 %vm2076_vm0, %v2075_v0 }
 0x4fa   :  { %1880 = vmatprep.subr.mxu0 %v2075_v0 }
 0x4fb   :  { %v2207_v14 = vpop.f32.mrf.mxu1 }
 0x4fc   :  { %1873 = vmatmul.mubr.msk.f32.vlgmr.msra.gmra.mxu0 %vm84_vm1, %v893_v11 }
 0x4fd   :  { %v2210_v15 = vpop.f32.mrf.mxu1  ;;  %1882 = vmatprep.mubr.msk.f32.mxu0 %vm2076_vm0, %v2075_v0  ;;  %1881 = vmatpush3.msra.mxu0 %v896_v43 }
 0x4fe   :  { %1890 = vmatprep.subr.mxu0 %v1217_v44 }
 0x4ff   :  { %v1040_v16 = vpop.f32.mrf.mxu1 }
 0x500   :  { %v1045_v17 = vmul.f32 0.59460354, %v1040_v16 }
 0x501   :  { %v1879_v18 = vpop.f32.mrf.mxu1 }
 0x502   :  { %v1047_v19 = vsel %vm79_vm3, %v1045_v17, -10000000.0 }
 0x503   :  { %v1051_v20 = vsel %vm84_vm1, %v1047_v19, -inf }
 0x504   :  { %1052 = vmax.xlane.f32.xlu1 %v1051_v20 }
 0x58d   :  { %v1053_v21 = vpop.xlane.xlu1 %1052 }
 0x58e   :  { %v1055_v22 = vsub.f32 %v1047_v19, %v1053_v21 }
 0x590   :  { %v1058_v23 = vmul.f32 1.442695, %v1055_v22  ;;  %v1306_v22 = vld [vmem:[#allocation5 + $0x38] sm:$0xff] }
 0x592   :  { %1945 = vpow2.f32 %v1058_v23  ;;  %v1626_v23 = vld [vmem:[#allocation8 + $0x18] sm:$0xff] }
 0x59f   :  { %v1946_v24 = vpop.eup %1945 }
 0x5a0   :  { %v1063_v25 = vsel %vm84_vm1, %v1946_v24, 0.0 }
 0x5a1   :  { %1064 = vadd.xlane.f32.xlu1 %v1063_v25 }
 0x5b8   :  { %v2219_v27 = vpop.f32.mrf.mxu0 }
 0x5b9   :  { %v889_v5 = vadd.f32 %v2207_v14, %v2219_v27 }
 0x5ba   :  { %v2221_v28 = vpop.f32.mrf.mxu0 }
 0x5bb   :  { %v884_v7 = vadd.f32 %v2210_v15, %v2221_v28 }
 0x5bc   :  { %v967_v29 = vpop.f32.mrf.mxu0 }
 0x5bd   :  { %v1044_v30 = vmul.f32 0.59460354, %v967_v29  ;;  %v1775_v29 = vld [vmem:[%s2275_s4] ss:$0 sm:$0xff] }
 0x5be   :  { %v1874_v31 = vpop.f32.mrf.mxu0 }
 0x5bf   :  { %v1046_v32 = vsel %vm78_vm2, %v1044_v30, -10000000.0 }
 0x5c0   :  { %v1048_v33 = vsel %vm84_vm1, %v1046_v32, -inf }
 0x5c1   :  { %1049 = vmax.xlane.f32.xlu0 %v1048_v33 }
 0x62a   :  { %v1065_v34 = vpop.xlane.xlu1 %1064 }
 0x62b   :  { %1947 = vrcp.f32 %v1065_v34 }
 0x638   :  { %v1948_v35 = vpop.eup %1947 }
 0x639   :  { %v1069_v36 = vmul.f32 %v1948_v35, %v1946_v24 }
 0x63b   :  { %1888 = vmatmul.mubr.msk.f32.vlgmr.msra.gmra.mxu1 %vm84_vm1, %v1069_v36 }
 0x63c   :  { %1896 = vmatpush3.xpose.msk.msra.mxu1 %vm84_vm1, %v1302_v37  ;;  %1897 = vmatprep.mubr.msk.f32.mxu1 %vm2076_vm0, %v2075_v0 }
 0x63d   :  { %1905 = vmatprep.subr.mxu1 %v2075_v0 }
 0x63f   :  { %1898 = vmatmul.mubr.msk.f32.vlgmr.msra.gmra.mxu1 %vm84_vm1, %v1302_v37 }
 0x640   :  { %1907 = vmatprep.mubr.msk.f32.mxu1 %vm2076_vm0, %v2075_v0  ;;  %1906 = vmatpush3.msra.mxu1 %v1305_v3 }
 0x641   :  { %1915 = vmatprep.subr.mxu1 %v1626_v23 }
 0x64a   :  { %v1050_v38 = vpop.xlane.xlu0 %1049 }
 0x64b   :  { %v1054_v39 = vsub.f32 %v1046_v32, %v1050_v38 }
 0x64d   :  { %v1056_v40 = vmul.f32 1.442695, %v1054_v39 }
 0x64f   :  { %1949 = vpow2.f32 %v1056_v40 }
 0x65c   :  { %v1950_v41 = vpop.eup %1949 }
 0x65d   :  { %v1060_v42 = vsel %vm84_vm1, %v1950_v41, 0.0 }
 0x65e   :  { %1061 = vadd.xlane.f32.xlu0 %v1060_v42 }
 0x6e7   :  { %v1062_v45 = vpop.xlane.xlu0 %1061 }
 0x6e8   :  { %1951 = vrcp.f32 %v1062_v45 }
 0x6f5   :  { %v1952_v46 = vpop.eup %1951 }
 0x6f6   :  { %v1068_v47 = vmul.f32 %v1952_v46, %v1950_v41 }
 0x6f8   :  { %1883 = vmatmul.mubr.msk.f32.vlgmr.msra.gmra.mxu0 %vm84_vm1, %v1068_v47 }
 0x6f9   :  { %1891 = vmatpush3.msra.mxu0 %v1217_v44 }
 0x6fa   :  { %1900 = vmatprep.subr.mxu0 %v2075_v0 }
 0x6fb   :  { %v1212_v48 = vpop.f32.mrf.mxu1 }
 0x6fd   :  { %v1889_v49 = vpop.f32.mrf.mxu1 }
 0x6ff   :  { %v1376_v50 = vpop.f32.mrf.mxu1 }
 0x700   :  { %v1453_v51 = vmul.f32 0.59460354, %v1376_v50 }
 0x701   :  { %v1899_v52 = vpop.f32.mrf.mxu1 }
 0x702   :  { %v1455_v53 = vsel %vm78_vm2, %v1453_v51, -10000000.0 }
 0x703   :  { %v1457_v54 = vsel %vm84_vm1, %v1455_v53, -inf }
 0x704   :  { %1458 = vmax.xlane.f32.xlu0 %v1457_v54 }
 0x78d   :  { %v1459_v55 = vpop.xlane.xlu0 %1458 }
 0x78e   :  { %v1463_v56 = vsub.f32 %v1455_v53, %v1459_v55 }
 0x790   :  { %v1465_v57 = vmul.f32 1.442695, %v1463_v56 }
 0x792   :  { %1953 = vpow2.f32 %v1465_v57 }
 0x79f   :  { %v1954_v58 = vpop.eup %1953 }
 0x7a0   :  { %v1469_v59 = vsel %vm84_vm1, %v1954_v58, 0.0 }
 0x7a1   :  { %1470 = vadd.xlane.f32.xlu0 %v1469_v59 }
 0x7b8   :  { %v1139_v60 = vpop.f32.mrf.mxu0 }
 0x7b9   :  { %1892 = vmatprep.mubr.msk.f32.mxu0 %vm84_vm1, %v1139_v60 }
 0x7ba   :  { %v1884_v62 = vpop.f32.mrf.mxu0  ;;  %1893 = vmatmul.mubr.msk.f32.vlgmr.msra.gmra.mxu0 %vm84_vm1, %v1212_v48 }
 0x7bb   :  { %1901 = vmatpush3.xpose.msk.msra.mxu0 %vm84_vm1, %v1303_v61  ;;  %1902 = vmatprep.mubr.msk.f32.mxu0 %vm2076_vm0, %v2075_v0 }
 0x7bc   :  { %1910 = vmatprep.subr.mxu0 %v2075_v0 }
 0x7be   :  { %1903 = vmatmul.mubr.msk.f32.vlgmr.msra.gmra.mxu0 %vm84_vm1, %v1303_v61 }
 0x7bf   :  { %1912 = vmatprep.mubr.msk.f32.mxu0 %vm2076_vm0, %v2075_v0  ;;  %1911 = vmatpush3.msra.mxu0 %v1306_v22 }
 0x82a   :  { %v1471_v63 = vpop.xlane.xlu0 %1470 }
 0x82b   :  { %1955 = vrcp.f32 %v1471_v63 }
 0x838   :  { %v1956_v1 = vpop.eup %1955 }
 0x839   :  { %v1477_v2 = vmul.f32 %v1956_v1, %v1954_v58 }
 0x83b   :  { %1908 = vmatmul.mubr.msk.f32.vlgmr.msra.gmra.mxu1 %vm84_vm1, %v1477_v2 }
 0x83c   :  { %1916 = vmatpush3.msra.mxu1 %v1626_v23 }
 0x87a   :  { %v1894_v6 = vpop.f32.mrf.mxu0 }
 0x87b   :  { %v1300_v8 = vadd.f32 %v1894_v6, %v889_v5 }
 0x87c   :  { %v1290_v9 = vpop.f32.mrf.mxu0 }
 0x87d   :  { %v1299_v10 = vadd.f32 %v1290_v9, %v884_v7 }
 0x87e   :  { %v1449_v11 = vpop.f32.mrf.mxu0 }
 0x87f   :  { %v1454_v0 = vmul.f32 0.59460354, %v1449_v11 }
 0x880   :  { %v1904_v12 = vpop.f32.mrf.mxu0 }
 0x881   :  { %v1456_v13 = vsel %vm79_vm3, %v1454_v0, -10000000.0 }
 0x882   :  { %v1460_v16 = vsel %vm84_vm1, %v1456_v13, -inf }
 0x883   :  { %1461 = vmax.xlane.f32.xlu1 %v1460_v16 }
 0x8fb   :  { %v1548_v17 = vpop.f32.mrf.mxu1 }
 0x8fc   :  { %1917 = vmatprep.mubr.msk.f32.mxu1 %vm84_vm1, %v1548_v17 }
 0x8fd   :  { %v1909_v14 = vpop.f32.mrf.mxu1 }
 0x90c   :  { %v1462_v18 = vpop.xlane.xlu1 %1461 }
 0x90d   :  { %v1464_v19 = vsub.f32 %v1456_v13, %v1462_v18 }
 0x90f   :  { %v1467_v20 = vmul.f32 1.442695, %v1464_v19 }
 0x911   :  { %1957 = vpow2.f32 %v1467_v20 }
 0x91e   :  { %v1958_v15 = vpop.eup %1957 }
 0x91f   :  { %v1472_v21 = vsel %vm84_vm1, %v1958_v15, 0.0 }
 0x920   :  { %1473 = vadd.xlane.f32.xlu1 %v1472_v21 }
 0x9a9   :  { %v1474_v4 = vpop.xlane.xlu1 %1473 }
 0x9aa   :  { %1959 = vrcp.f32 %v1474_v4 }
 0x9b7   :  { %v1960_v24 = vpop.eup %1959 }
 0x9b8   :  { %v1478_v25 = vmul.f32 %v1960_v24, %v1958_v15 }
 0x9ba   :  { %1913 = vmatmul.mubr.msk.f32.vlgmr.msra.gmra.mxu0 %vm84_vm1, %v1478_v25 }
 0xa7a   :  { %v1621_v26 = vpop.f32.mrf.mxu0 }
 0xa7b   :  { %1918 = vmatmul.mubr.msk.f32.vlgmr.msra.gmra.mxu1 %vm84_vm1, %v1621_v26 }
 0xa7c   :  { %v1914_v27 = vpop.f32.mrf.mxu0 }
 0xb3b   :  { %v1919_v28 = vpop.f32.mrf.mxu1 }
 0xb3c   :  { %v1709_v30 = vadd.f32 %v1919_v28, %v1300_v8 }
 0xb3d   :  { %v1699_v31 = vpop.f32.mrf.mxu1 }
 0xb3e   :  { %v1718_v32 = vadd.f32 %v1775_v29, %v1709_v30  ;;  %v1708_v33 = vadd.f32 %v1699_v31, %v1299_v10 }
 0xb40   :  { %v1720_v34 = vmax.f32 %v1718_v32, 0.0  ;;  %v1717_v35 = vadd.f32 %v1775_v29, %v1708_v33 }
 0xb42   :  { %v1719_v36 = vmax.f32 %v1717_v35, 0.0  ;;  %1723 = vst.msk [vmem:[#allocation10 + $0x8] sm:$0xff] %vm1721_vm4, %v1720_v34 }
 0xb44   :  { %1722 = vst.msk [vmem:[#allocation10] sm:$0xff] %vm1721_vm4, %v1719_v36 }
 0xb45   :  { %2052 = shalt.err (!%p2049_p10)
}
 0xb46   :  { %1735 = dma.vmem_to_hbm [thread:$0]  %s1730_s14, 256, %s2276_s5, [#allocation4], %s2071_s23, %s2071_s23, %s2072_s24  }
 0xb47   :  { %2067 = dma.done.wait [#allocation4], 256  }
 0xb48   :  { %2068 = vsyncadd [#allocation4], 4294967040 }
 0xb49   :  { %1739 = vsyncpa [#allocation3], 1 }
 0xb4a   :  { %1740 = vsyncpa [#allocation6], 1 }
 0xb4b   :  { %1741 = vsyncpa [#allocation9], 1 }
 0xb4c   :  { %1742 = vsyncpa [#allocation4], 1 }

</bundles_post_ra>
